<compile_context>
chip_gen: v5e
topology: v5e:2x2
jax: 0.10.0
libtpu: 0.0.40
codegen_flags: <defaults>
</compile_context>

<pallas_src>
import functools

import jax
import jax.numpy as jnp
import numpy as np
from jax import lax
from jax.experimental import pallas as pl
from jax.experimental.pallas import tpu as pltpu


def _dconv_block_kernel(prev_ref, xg_ref, wc_ref, g_ref, o_ref, *,
                        n_blocks, n_batch, block_c):
    """Blocked autoregressive recurrence; all batch rows advance together.

    prev_ref : (B, C)              initial carry a_{-1} = x[:, 0, :]
    xg_ref   : (n_blocks*B, m*Kt)  look-ahead taps, block-flattened (block-major rows)
    wc_ref   : (C, m*C)            [W0^m | W0^{m-1} | ... | W0^1]  (column-reversed)
    g_ref    : (m*Kt, m*C)         causal tap -> output matrix     (column-reversed)
    o_ref    : (n_blocks*B, m*C)   a_{b*m+j} stored at column block p = m-1-j
    """
    # Hoisted off the serial path: ONE batched matmul covers every block's
    # look-ahead contribution (dense M = n_blocks*B rows per MXU feed).   [rev #1,#4]
    la_all = jnp.dot(xg_ref[...], g_ref[...],
                     preferred_element_type=jnp.float32)        # (n_blocks*B, m*C)
    wc = wc_ref[...]
    prev = prev_ref[...]

    outs = []
    for b in range(n_blocks):          # static, tiny trip count, fully LLO-visible
        la_b = la_all[b * n_batch:(b + 1) * n_batch, :]
        # Dependent path: one small carry matmul + add per block.
        ab = jnp.dot(prev, wc, preferred_element_type=jnp.float32) + la_b
        outs.append(ab)
        prev = ab[:, :block_c]         # carry a_{(b+1)m-1} sits at lane 0   [rev #6]

    # Single lane/sublane-dense slab store (unmasked (8,128) tiles).        [rev #4]
    o_ref[...] = jnp.concatenate(outs, axis=0)


def dilated_conv_forward(x, weight, n_dil, *, lookahead_bf16=False):
    """x: (B, C_in, N) f32 (PyTorch NCW); weight: (C_out, C_in, n_filt). Jittable."""
    n_batch, n_in_chan, n_elem = x.shape
    n_out_chan, c_in2, n_filt = weight.shape
    assert c_in2 == n_in_chan and n_out_chan == n_in_chan, (
        "DilatedConv.forward implicitly requires n_out_chan == n_in_chan")
    c = n_in_chan
    filter_size = (n_filt - 1) * n_dil + 1
    n_steps = n_elem - filter_size
    assert n_steps > 0

    # Block size: pack m steps on the lane axis (up to 256 lanes/row).  Serial MXU
    # chain = n_blocks (4 here, was 8) and n_blocks*B = 8 rows, so the hoisted
    # look-ahead matmul has a full-sublane LHS and the output store is one
    # unmasked (8, m*C) slab.                                        [rev #2, rev #4]
    m = max(1, min(n_steps, 256 // max(c, 1)))
    n_blocks = -(-n_steps // m)                    # cdiv
    s_pad = n_blocks * m
    k1 = n_filt - 1

    x = x.astype(jnp.float32)
    w_t = jnp.transpose(weight.astype(jnp.float32), (2, 1, 0))   # (n_filt, C_in, C_out)
    w0 = w_t[0]

    # ---- weight-derived constants, built on device (jittable) ------------- [rev #9]
    def _pow_step(p, _):
        p_next = jnp.dot(p, w0, preferred_element_type=jnp.float32)
        return p_next, p_next
    eye = jnp.eye(c, dtype=jnp.float32)
    _, pow1 = lax.scan(_pow_step, eye, None, length=m)           # W0^1 .. W0^m
    # Column-reversed carry matrix: column block p holds W0^{m-p}  (carry -> lane 0).
    wcarry = jnp.transpose(pow1[::-1], (1, 0, 2)).reshape(c, m * c)

    if k1 > 0:
        kt = k1 * c
        pow0 = jnp.concatenate([eye[None], pow1[:m - 1]], axis=0)  # W0^0 .. W0^{m-1}
        mk = jnp.einsum("kab,dbc->kdac", w_t[1:], pow0)            # (k1, m, C, C)
        d = jnp.arange(m)[None, :] - jnp.arange(m)[:, None]        # (m_t, m_j): j - t
        gblk = mk[:, jnp.clip(d, 0, m - 1)]                        # (k1, m_t, m_j, C, C)
        gblk = gblk * (d >= 0).astype(jnp.float32)[None, :, :, None, None]
        g_mat = (gblk.transpose(1, 0, 3, 2, 4)                     # (m_t, k1, C_a, m_j, C_c)
                     [:, :, :, ::-1, :]                            # reverse j -> p
                     .reshape(m * kt, m * c))
    else:
        # n_filt == 1: no look-ahead taps; zero dummies keep shapes/lowering valid.
        kt = c
        g_mat = jnp.zeros((m * kt, m * c), jnp.float32)

    # ---- data-side layout plumbing (fuses under jit) ----------------------- [rev #8]
    x_t = jnp.transpose(x, (0, 2, 1))                              # (B, N, C)
    prev0 = x_t[:, 0, :]                                           # (B, C)
    if k1 > 0:
        taps = jnp.stack([x_t[:, k * n_dil:k * n_dil + n_steps, :]
                          for k in range(1, n_filt)], axis=2)      # (B, n_steps, k1, C)
        taps = jnp.pad(taps, ((0, 0), (0, s_pad - n_steps), (0, 0), (0, 0)))
        xg = (taps.reshape(n_batch, n_blocks, m, kt)
                  .transpose(1, 0, 2, 3)
                  .reshape(n_blocks * n_batch, m * kt))            # (n_blocks*B, m*Kt)
    else:
        xg = jnp.zeros((n_blocks * n_batch, m * kt), jnp.float32)

    if lookahead_bf16:   # bf16 only off the carry chain; relax test atol if enabled [rev #5]
        xg = xg.astype(jnp.bfloat16)
        g_mat = g_mat.astype(jnp.bfloat16)

    kernel = functools.partial(_dconv_block_kernel, n_blocks=n_blocks,
                               n_batch=n_batch, block_c=c)
    # VMEM: all operands (incl. G = (m*Kt, m*C) f32 = 512 KiB here) total well under
    # the 32 MiB scoped limit on every generation, including v7x's 64 MiB VMEM.
    # TODO(synk): for much larger m/C on v7x, single-buffer the constant wc/g specs
    # (pipeline_mode=pl.Buffered(1)) and re-budget vmem_limit_bytes.
    # TODO(synk): for large n_batch on v7x (2 TensorCores) add a leading 'parallel'
    # grid axis over batch tiles; at B=2 it would only add overhead on 1-TC v5e/v6e.
    a_blocked = pl.pallas_call(
        kernel,
        out_shape=jax.ShapeDtypeStruct((n_blocks * n_batch, m * c), jnp.float32),
        grid=(1,),
        in_specs=[
            pl.BlockSpec((n_batch, c), lambda i: (0, 0)),
            pl.BlockSpec((n_blocks * n_batch, m * kt), lambda i: (0, 0)),
            pl.BlockSpec((c, m * c), lambda i: (0, 0)),
            pl.BlockSpec((m * kt, m * c), lambda i: (0, 0)),
        ],
        out_specs=pl.BlockSpec((n_blocks * n_batch, m * c), lambda i: (0, 0)),
        compiler_params=pltpu.CompilerParams(
            dimension_semantics=("arbitrary",),
            vmem_limit_bytes=32 * 1024 * 1024),
    )(prev0, xg, wcarry, g_mat)

    # Un-block (pure layout, fused under jit): undo the column reversal, then splice
    # rows 1..n_steps straight back into x in its original (B, C, N) layout.
    a_all = (a_blocked.reshape(n_blocks, n_batch, m, c)[:, :, ::-1, :]
                      .transpose(1, 0, 2, 3)
                      .reshape(n_batch, s_pad, c)[:, :n_steps, :])   # (B, n_steps, C)
    return x.at[:, :, 1:n_steps + 1].set(jnp.transpose(a_all, (0, 2, 1)))


def reference_forward(x, weight, n_dil):
    """Pure-JAX faithful simulation of the PyTorch loop (verification only)."""
    n_filt = weight.shape[2]
    filter_size = (n_filt - 1) * n_dil + 1
    n_steps = x.shape[2] - filter_size

    def step(i, xs):
        window = lax.dynamic_slice_in_dim(xs, i, filter_size, axis=2)  # (B, C, fs)
        taps = window[:, :, ::n_dil]                                   # (B, C, n_filt)
        a_i = jnp.einsum("ock,bck->bo", weight, taps)
        return lax.dynamic_update_slice_in_dim(xs, a_i[:, :, None], i + 1, axis=2)

    return lax.fori_loop(0, n_steps, step, x)


if __name__ == "__main__":
    # Small shapes consistent with the module: x is (n_batch, n_in_chan, n_elem).
    n_batch, n_in_chan, n_out_chan = 2, 8, 8
    n_elem, n_filt, n_dil = 128, 3, 2

    key = jax.random.PRNGKey(0)
    kw, kx = jax.random.split(key)

    # Deterministic xavier_uniform_-style init for the (C_out, C_in, n_filt) weight.
    fan_in, fan_out = n_in_chan * n_filt, n_out_chan * n_filt
    bound = float(np.sqrt(6.0 / (fan_in + fan_out)))
    weight = jax.random.uniform(kw, (n_out_chan, n_in_chan, n_filt),
                                jnp.float32, minval=-bound, maxval=bound)
    x = jax.random.normal(kx, (n_batch, n_in_chan, n_elem), jnp.float32)
    # NOTE: the torch.randn(...) buffer `a` in forward() never influences the returned
    # x (every element is overwritten before use), so no in-kernel randomness is needed.

    fwd = jax.jit(dilated_conv_forward, static_argnames=("n_dil", "lookahead_bf16"))
    out = jax.block_until_ready(fwd(x, weight, n_dil=n_dil))
    ref = jax.block_until_ready(reference_forward(x, weight, n_dil))
    np.testing.assert_allclose(np.asarray(out), np.asarray(ref), rtol=2e-3, atol=5e-4)
    print("KERNEL_OK")
</pallas_src>

<mosaic_0001>
module attributes {stable_mosaic.version = 11 : i64} {
  func.func @_dconv_block_kernel(%arg0: i32, %arg1: memref<2x8xf32, #tpu.memory_space<vmem>>, %arg2: memref<8x512xf32, #tpu.memory_space<vmem>>, %arg3: memref<8x256xf32, #tpu.memory_space<vmem>>, %arg4: memref<512x256xf32, #tpu.memory_space<vmem>>, %arg5: memref<8x256xf32, #tpu.memory_space<vmem>>) attributes {dimension_semantics = [#tpu.dimension_semantics<arbitrary>], iteration_bounds = array<i64: 1>, scalar_prefetch = 0 : i64, scratch_operands = 0 : i64, tpu.core_type = #tpu.core_type<tc>, window_params = [{pipeline_mode = #tpu.pipeline_mode<synchronous>, transform_indices = @transform_0, window_bounds = array<i64: 2, 8>}, {pipeline_mode = #tpu.pipeline_mode<synchronous>, transform_indices = @transform_1, window_bounds = array<i64: 8, 512>}, {pipeline_mode = #tpu.pipeline_mode<synchronous>, transform_indices = @transform_2, window_bounds = array<i64: 8, 256>}, {pipeline_mode = #tpu.pipeline_mode<synchronous>, transform_indices = @transform_3, window_bounds = array<i64: 512, 256>}, {pipeline_mode = #tpu.pipeline_mode<synchronous>, transform_indices = @transform_4, window_bounds = array<i64: 8, 256>}]} {
    %c0 = arith.constant 0 : index
    %c0_0 = arith.constant 0 : index
    %0 = vector.load %arg2[%c0, %c0_0] : memref<8x512xf32, #tpu.memory_space<vmem>>, vector<8x512xf32>
    %c0_1 = arith.constant 0 : index
    %c0_2 = arith.constant 0 : index
    %1 = vector.load %arg4[%c0_1, %c0_2] : memref<512x256xf32, #tpu.memory_space<vmem>>, vector<512x256xf32>
    %cst = arith.constant dense<0.000000e+00> : vector<8x256xf32>
    %2 = tpu.matmul %0, %1, %cst {dimension_numbers = #tpu.dot_dimension_numbers<[1], [0], [0], [1], [0, 0, 1, 1], [], []>} : vector<8x512xf32>, vector<512x256xf32>, vector<8x256xf32> -> vector<8x256xf32>
    %c0_3 = arith.constant 0 : index
    %c0_4 = arith.constant 0 : index
    %3 = vector.load %arg3[%c0_3, %c0_4] : memref<8x256xf32, #tpu.memory_space<vmem>>, vector<8x256xf32>
    %c0_5 = arith.constant 0 : index
    %c0_6 = arith.constant 0 : index
    %4 = vector.load %arg1[%c0_5, %c0_6] : memref<2x8xf32, #tpu.memory_space<vmem>>, vector<2x8xf32>
    %5 = vector.extract_strided_slice %2 {offsets = [0, 0], sizes = [2, 256], strides = [1, 1]} : vector<8x256xf32> to vector<2x256xf32>
    %cst_7 = arith.constant dense<0.000000e+00> : vector<2x256xf32>
    %6 = tpu.matmul %4, %3, %cst_7 {dimension_numbers = #tpu.dot_dimension_numbers<[1], [0], [0], [1], [0, 0, 1, 1], [], []>} : vector<2x8xf32>, vector<8x256xf32>, vector<2x256xf32> -> vector<2x256xf32>
    %7 = arith.addf %6, %5 : vector<2x256xf32>
    %8 = vector.extract_strided_slice %7 {offsets = [0, 0], sizes = [2, 8], strides = [1, 1]} : vector<2x256xf32> to vector<2x8xf32>
    %9 = vector.extract_strided_slice %2 {offsets = [2, 0], sizes = [2, 256], strides = [1, 1]} : vector<8x256xf32> to vector<2x256xf32>
    %cst_8 = arith.constant dense<0.000000e+00> : vector<2x256xf32>
    %10 = tpu.matmul %8, %3, %cst_8 {dimension_numbers = #tpu.dot_dimension_numbers<[1], [0], [0], [1], [0, 0, 1, 1], [], []>} : vector<2x8xf32>, vector<8x256xf32>, vector<2x256xf32> -> vector<2x256xf32>
    %11 = arith.addf %10, %9 : vector<2x256xf32>
    %12 = vector.extract_strided_slice %11 {offsets = [0, 0], sizes = [2, 8], strides = [1, 1]} : vector<2x256xf32> to vector<2x8xf32>
    %13 = vector.extract_strided_slice %2 {offsets = [4, 0], sizes = [2, 256], strides = [1, 1]} : vector<8x256xf32> to vector<2x256xf32>
    %cst_9 = arith.constant dense<0.000000e+00> : vector<2x256xf32>
    %14 = tpu.matmul %12, %3, %cst_9 {dimension_numbers = #tpu.dot_dimension_numbers<[1], [0], [0], [1], [0, 0, 1, 1], [], []>} : vector<2x8xf32>, vector<8x256xf32>, vector<2x256xf32> -> vector<2x256xf32>
    %15 = arith.addf %14, %13 : vector<2x256xf32>
    %16 = vector.extract_strided_slice %15 {offsets = [0, 0], sizes = [2, 8], strides = [1, 1]} : vector<2x256xf32> to vector<2x8xf32>
    %17 = vector.extract_strided_slice %2 {offsets = [6, 0], sizes = [2, 256], strides = [1, 1]} : vector<8x256xf32> to vector<2x256xf32>
    %cst_10 = arith.constant dense<0.000000e+00> : vector<2x256xf32>
    %18 = tpu.matmul %16, %3, %cst_10 {dimension_numbers = #tpu.dot_dimension_numbers<[1], [0], [0], [1], [0, 0, 1, 1], [], []>} : vector<2x8xf32>, vector<8x256xf32>, vector<2x256xf32> -> vector<2x256xf32>
    %19 = arith.addf %18, %17 : vector<2x256xf32>
    %20 = tpu.concatenate %7, %11, %15, %19 in 0 : vector<2x256xf32>, vector<2x256xf32>, vector<2x256xf32>, vector<2x256xf32> -> vector<8x256xf32>
    %c0_11 = arith.constant 0 : index
    %c0_12 = arith.constant 0 : index
    %21 = vector.load %arg5[%c0_11, %c0_12] : memref<8x256xf32, #tpu.memory_space<vmem>>, vector<8x256xf32>
    tpu.vector_store %arg5[%c0_11, %c0_12], %20 {strides = array<i32>} : memref<8x256xf32, #tpu.memory_space<vmem>>, vector<8x256xf32>,
    return
  }
  func.func @transform_0(%arg0: i32) -> (i32, i32) {
    %c0_i32 = arith.constant 0 : i32
    %c0_i32_0 = arith.constant 0 : i32
    %c0_i32_1 = arith.constant 0 : i32
    return %c0_i32, %c0_i32_0 : i32, i32
  }
  func.func @transform_1(%arg0: i32) -> (i32, i32) {
    %c0_i32 = arith.constant 0 : i32
    %c0_i32_0 = arith.constant 0 : i32
    %c0_i32_1 = arith.constant 0 : i32
    return %c0_i32, %c0_i32_0 : i32, i32
  }
  func.func @transform_2(%arg0: i32) -> (i32, i32) {
    %c0_i32 = arith.constant 0 : i32
    %c0_i32_0 = arith.constant 0 : i32
    %c0_i32_1 = arith.constant 0 : i32
    return %c0_i32, %c0_i32_0 : i32, i32
  }
  func.func @transform_3(%arg0: i32) -> (i32, i32) {
    %c0_i32 = arith.constant 0 : i32
    %c0_i32_0 = arith.constant 0 : i32
    %c0_i32_1 = arith.constant 0 : i32
    return %c0_i32, %c0_i32_0 : i32, i32
  }
  func.func @transform_4(%arg0: i32) -> (i32, i32) {
    %c0_i32 = arith.constant 0 : i32
    %c0_i32_0 = arith.constant 0 : i32
    %c0_i32_1 = arith.constant 0 : i32
    return %c0_i32, %c0_i32_0 : i32, i32
  }
}

</mosaic_0001>

<bundles_post_ra>
// kernel: custom-call.2
= control target key start
LH: loop header
LB: loop body
LE: loop exit
PB: predicated region body
PF: predicated region fallthrough
CT: control target
= control target key end

     0   :  { %s6_s0 = inlined_call_operand.vmem [shape: f32[32,8,8], index: 0, kind: output, shape index: {}]  }

// kernel: dilated_conv_forward.1
= control target key start
LH: loop header
LB: loop body
LE: loop exit
PB: predicated region body
PF: predicated region fallthrough
CT: control target
= control target key end

     0   :  { %vm312_vm0 = vcmask 64512   ;;  %vm515_vm1 = vcmask 1041408   ;;  %vm518_vm2 = vcmask 1043456   ;;  %vm521_vm3 = vcmask 1045504   ;;  %s990_s3 = inlined_call_operand.vmem [shape: f32[512,256], index: 3, kind: input, shape index: {}]   ;;  %s991_s1 = inlined_call_operand.vmem [shape: f32[8,512], index: 1, kind: input, shape index: {}]   ;;  %s992_s2 = inlined_call_operand.vmem [shape: f32[8,256], index: 2, kind: input, shape index: {}]   ;;  %s993_s0 = inlined_call_operand.vmem [shape: f32[2,8], index: 0, kind: input, shape index: {}]   ;;  %s994_s4 = inlined_call_operand.vmem [shape: f32[8,256], index: 4, kind: output, shape index: {}]  }
   0x1   :  { %v51_v0 = vld [vmem:[%s990_s3 + $0xf0] sm:$0xff]  ;;  %v49_v3 = vld [vmem:[%s990_s3 + $0xe0] sm:$0xff]  ;;  %v52_v63 = vld [vmem:[%s990_s3 + $0xf8] sm:$0xff] }
   0x2   :  { %v83_v1 = vld [vmem:[%s990_s3 + $0x1f0] sm:$0xff]  ;;  %149 = vmatpush.msra.mxu0 %v51_v0  ;;  %v81_v4 = vld [vmem:[%s990_s3 + $0x1e0] sm:$0xff]  ;;  %v84_v0 = vld [vmem:[%s990_s3 + $0x1f8] sm:$0xff] }
   0x3   :  { %v115_v2 = vld [vmem:[%s990_s3 + $0x2f0] sm:$0xff]  ;;  %169 = vmatpush.msra.mxu1 %v83_v1  ;;  %v113_v5 = vld [vmem:[%s990_s3 + $0x2e0] sm:$0xff]  ;;  %v116_v1 = vld [vmem:[%s990_s3 + $0x2f8] sm:$0xff] }
   0x4   :  { %189 = vmatpush.msra.mxu2 %v115_v2  ;;  %v147_v6 = vld [vmem:[%s990_s3 + $0x3f0] sm:$0xff]  ;;  %150 = vmatpush.msra.mxu0 %v49_v3  ;;  %v145_v10 = vld [vmem:[%s990_s3 + $0x3e0] sm:$0xff]  ;;  %v50_v3 = vld [vmem:[%s990_s3 + $0xe8] sm:$0xff] }
   0x5   :  { %v47_v7 = vld [vmem:[%s990_s3 + $0xd0] sm:$0xff]  ;;  %170 = vmatpush.msra.mxu1 %v81_v4  ;;  %209 = vmatpush.msra.mxu3 %v147_v6  ;;  %v45_v11 = vld [vmem:[%s990_s3 + $0xc0] sm:$0xff]  ;;  %v82_v4 = vld [vmem:[%s990_s3 + $0x1e8] sm:$0xff] }
   0x6   :  { %v79_v8 = vld [vmem:[%s990_s3 + $0x1d0] sm:$0xff]  ;;  %190 = vmatpush.msra.mxu2 %v113_v5  ;;  %v77_v12 = vld [vmem:[%s990_s3 + $0x1c0] sm:$0xff]  ;;  %151 = vmatpush.msra.mxu0 %v47_v7  ;;  %v114_v5 = vld [vmem:[%s990_s3 + $0x2e8] sm:$0xff] }
   0x7   :  { %v111_v9 = vld [vmem:[%s990_s3 + $0x2d0] sm:$0xff]  ;;  %171 = vmatpush.msra.mxu1 %v79_v8  ;;  %v109_v13 = vld [vmem:[%s990_s3 + $0x2c0] sm:$0xff]  ;;  %210 = vmatpush.msra.mxu3 %v145_v10  ;;  %v148_v6 = vld [vmem:[%s990_s3 + $0x3f8] sm:$0xff] }
   0x8   :  { %v143_v14 = vld [vmem:[%s990_s3 + $0x3d0] sm:$0xff]  ;;  %191 = vmatpush.msra.mxu2 %v111_v9  ;;  %152 = vmatpush.msra.mxu0 %v45_v11  ;;  %v141_v18 = vld [vmem:[%s990_s3 + $0x3c0] sm:$0xff]  ;;  %v48_v7 = vld [vmem:[%s990_s3 + $0xd8] sm:$0xff] }
   0x9   :  { %v43_v15 = vld [vmem:[%s990_s3 + $0xb0] sm:$0xff]  ;;  %172 = vmatpush.msra.mxu1 %v77_v12  ;;  %211 = vmatpush.msra.mxu3 %v143_v14  ;;  %v41_v19 = vld [vmem:[%s990_s3 + $0xa0] sm:$0xff]  ;;  %v80_v8 = vld [vmem:[%s990_s3 + $0x1d8] sm:$0xff] }
   0xa   :  { %v75_v16 = vld [vmem:[%s990_s3 + $0x1b0] sm:$0xff]  ;;  %192 = vmatpush.msra.mxu2 %v109_v13  ;;  %v73_v20 = vld [vmem:[%s990_s3 + $0x1a0] sm:$0xff]  ;;  %153 = vmatpush.msra.mxu0 %v43_v15  ;;  %v112_v9 = vld [vmem:[%s990_s3 + $0x2d8] sm:$0xff] }
   0xb   :  { %v107_v17 = vld [vmem:[%s990_s3 + $0x2b0] sm:$0xff]  ;;  %173 = vmatpush.msra.mxu1 %v75_v16  ;;  %v105_v21 = vld [vmem:[%s990_s3 + $0x2a0] sm:$0xff]  ;;  %212 = vmatpush.msra.mxu3 %v141_v18  ;;  %v146_v10 = vld [vmem:[%s990_s3 + $0x3e8] sm:$0xff] }
   0xc   :  { %v139_v22 = vld [vmem:[%s990_s3 + $0x3b0] sm:$0xff]  ;;  %193 = vmatpush.msra.mxu2 %v107_v17  ;;  %154 = vmatpush.msra.mxu0 %v41_v19  ;;  %v137_v26 = vld [vmem:[%s990_s3 + $0x3a0] sm:$0xff]  ;;  %v46_v11 = vld [vmem:[%s990_s3 + $0xc8] sm:$0xff] }
   0xd   :  { %v39_v23 = vld [vmem:[%s990_s3 + $0x90] sm:$0xff]  ;;  %174 = vmatpush.msra.mxu1 %v73_v20  ;;  %213 = vmatpush.msra.mxu3 %v139_v22  ;;  %v37_v27 = vld [vmem:[%s990_s3 + $0x80] sm:$0xff]  ;;  %v78_v12 = vld [vmem:[%s990_s3 + $0x1c8] sm:$0xff] }
   0xe   :  { %v71_v24 = vld [vmem:[%s990_s3 + $0x190] sm:$0xff]  ;;  %194 = vmatpush.msra.mxu2 %v105_v21  ;;  %v69_v28 = vld [vmem:[%s990_s3 + $0x180] sm:$0xff]  ;;  %155 = vmatpush.msra.mxu0 %v39_v23  ;;  %v110_v13 = vld [vmem:[%s990_s3 + $0x2c8] sm:$0xff] }
   0xf   :  { %v103_v25 = vld [vmem:[%s990_s3 + $0x290] sm:$0xff]  ;;  %175 = vmatpush.msra.mxu1 %v71_v24  ;;  %v101_v29 = vld [vmem:[%s990_s3 + $0x280] sm:$0xff]  ;;  %214 = vmatpush.msra.mxu3 %v137_v26  ;;  %v144_v14 = vld [vmem:[%s990_s3 + $0x3d8] sm:$0xff] }
  0x10   :  { %v135_v30 = vld [vmem:[%s990_s3 + $0x390] sm:$0xff]  ;;  %195 = vmatpush.msra.mxu2 %v103_v25  ;;  %156 = vmatpush.msra.mxu0 %v37_v27  ;;  %v133_v34 = vld [vmem:[%s990_s3 + $0x380] sm:$0xff]  ;;  %v44_v15 = vld [vmem:[%s990_s3 + $0xb8] sm:$0xff] }
  0x11   :  { %v35_v31 = vld [vmem:[%s990_s3 + $0x70] sm:$0xff]  ;;  %176 = vmatpush.msra.mxu1 %v69_v28  ;;  %215 = vmatpush.msra.mxu3 %v135_v30  ;;  %v33_v35 = vld [vmem:[%s990_s3 + $0x60] sm:$0xff]  ;;  %v76_v16 = vld [vmem:[%s990_s3 + $0x1b8] sm:$0xff] }
  0x12   :  { %v67_v32 = vld [vmem:[%s990_s3 + $0x170] sm:$0xff]  ;;  %196 = vmatpush.msra.mxu2 %v101_v29  ;;  %v65_v36 = vld [vmem:[%s990_s3 + $0x160] sm:$0xff]  ;;  %157 = vmatpush.msra.mxu0 %v35_v31  ;;  %v108_v17 = vld [vmem:[%s990_s3 + $0x2b8] sm:$0xff] }
  0x13   :  { %v99_v33 = vld [vmem:[%s990_s3 + $0x270] sm:$0xff]  ;;  %177 = vmatpush.msra.mxu1 %v67_v32  ;;  %v97_v37 = vld [vmem:[%s990_s3 + $0x260] sm:$0xff]  ;;  %216 = vmatpush.msra.mxu3 %v133_v34  ;;  %v142_v18 = vld [vmem:[%s990_s3 + $0x3c8] sm:$0xff] }
  0x14   :  { %v131_v38 = vld [vmem:[%s990_s3 + $0x370] sm:$0xff]  ;;  %197 = vmatpush.msra.mxu2 %v99_v33  ;;  %158 = vmatpush.msra.mxu0 %v33_v35  ;;  %v129_v42 = vld [vmem:[%s990_s3 + $0x360] sm:$0xff]  ;;  %v42_v19 = vld [vmem:[%s990_s3 + $0xa8] sm:$0xff] }
  0x15   :  { %v31_v39 = vld [vmem:[%s990_s3 + $0x50] sm:$0xff]  ;;  %178 = vmatpush.msra.mxu1 %v65_v36  ;;  %217 = vmatpush.msra.mxu3 %v131_v38  ;;  %v29_v43 = vld [vmem:[%s990_s3 + $0x40] sm:$0xff]  ;;  %v74_v20 = vld [vmem:[%s990_s3 + $0x1a8] sm:$0xff] }
  0x16   :  { %v63_v40 = vld [vmem:[%s990_s3 + $0x150] sm:$0xff]  ;;  %198 = vmatpush.msra.mxu2 %v97_v37  ;;  %v61_v44 = vld [vmem:[%s990_s3 + $0x140] sm:$0xff]  ;;  %159 = vmatpush.msra.mxu0 %v31_v39  ;;  %v106_v21 = vld [vmem:[%s990_s3 + $0x2a8] sm:$0xff] }
  0x17   :  { %v95_v41 = vld [vmem:[%s990_s3 + $0x250] sm:$0xff]  ;;  %179 = vmatpush.msra.mxu1 %v63_v40  ;;  %v93_v45 = vld [vmem:[%s990_s3 + $0x240] sm:$0xff]  ;;  %218 = vmatpush.msra.mxu3 %v129_v42  ;;  %v140_v22 = vld [vmem:[%s990_s3 + $0x3b8] sm:$0xff] }
  0x18   :  { %v127_v46 = vld [vmem:[%s990_s3 + $0x350] sm:$0xff]  ;;  %199 = vmatpush.msra.mxu2 %v95_v41  ;;  %160 = vmatpush.msra.mxu0 %v29_v43  ;;  %v125_v50 = vld [vmem:[%s990_s3 + $0x340] sm:$0xff]  ;;  %v40_v23 = vld [vmem:[%s990_s3 + $0x98] sm:$0xff] }
  0x19   :  { %v27_v47 = vld [vmem:[%s990_s3 + $0x30] sm:$0xff]  ;;  %180 = vmatpush.msra.mxu1 %v61_v44  ;;  %219 = vmatpush.msra.mxu3 %v127_v46  ;;  %v25_v51 = vld [vmem:[%s990_s3 + $0x20] sm:$0xff]  ;;  %v72_v24 = vld [vmem:[%s990_s3 + $0x198] sm:$0xff] }
  0x1a   :  { %v59_v48 = vld [vmem:[%s990_s3 + $0x130] sm:$0xff]  ;;  %200 = vmatpush.msra.mxu2 %v93_v45  ;;  %v57_v52 = vld [vmem:[%s990_s3 + $0x120] sm:$0xff]  ;;  %161 = vmatpush.msra.mxu0 %v27_v47  ;;  %v104_v25 = vld [vmem:[%s990_s3 + $0x298] sm:$0xff] }
  0x1b   :  { %v91_v49 = vld [vmem:[%s990_s3 + $0x230] sm:$0xff]  ;;  %181 = vmatpush.msra.mxu1 %v59_v48  ;;  %v89_v53 = vld [vmem:[%s990_s3 + $0x220] sm:$0xff]  ;;  %220 = vmatpush.msra.mxu3 %v125_v50  ;;  %v138_v26 = vld [vmem:[%s990_s3 + $0x3a8] sm:$0xff] }
  0x1c   :  { %v123_v54 = vld [vmem:[%s990_s3 + $0x330] sm:$0xff]  ;;  %201 = vmatpush.msra.mxu2 %v91_v49  ;;  %162 = vmatpush.msra.mxu0 %v25_v51  ;;  %v121_v58 = vld [vmem:[%s990_s3 + $0x320] sm:$0xff]  ;;  %v38_v27 = vld [vmem:[%s990_s3 + $0x88] sm:$0xff] }
  0x1d   :  { %v23_v55 = vld [vmem:[%s990_s3 + $0x10] sm:$0xff]  ;;  %182 = vmatpush.msra.mxu1 %v57_v52  ;;  %221 = vmatpush.msra.mxu3 %v123_v54  ;;  %v21_v59 = vld [vmem:[%s990_s3] sm:$0xff]  ;;  %v70_v28 = vld [vmem:[%s990_s3 + $0x188] sm:$0xff] }
  0x1e   :  { %v55_v56 = vld [vmem:[%s990_s3 + $0x110] sm:$0xff]  ;;  %202 = vmatpush.msra.mxu2 %v89_v53  ;;  %v53_v60 = vld [vmem:[%s990_s3 + $0x100] sm:$0xff]  ;;  %163 = vmatpush.msra.mxu0 %v23_v55  ;;  %v102_v29 = vld [vmem:[%s990_s3 + $0x288] sm:$0xff] }
  0x1f   :  { %v87_v57 = vld [vmem:[%s990_s3 + $0x210] sm:$0xff]  ;;  %183 = vmatpush.msra.mxu1 %v55_v56  ;;  %v85_v61 = vld [vmem:[%s990_s3 + $0x200] sm:$0xff]  ;;  %222 = vmatpush.msra.mxu3 %v121_v58  ;;  %v136_v30 = vld [vmem:[%s990_s3 + $0x398] sm:$0xff] }
  0x20   :  { %v119_v62 = vld [vmem:[%s990_s3 + $0x310] sm:$0xff]  ;;  %203 = vmatpush.msra.mxu2 %v87_v57  ;;  %164 = vmatpush.msra.mxu0 %v21_v59  ;;  %v117_v2 = vld [vmem:[%s990_s3 + $0x300] sm:$0xff]  ;;  %v36_v31 = vld [vmem:[%s990_s3 + $0x78] sm:$0xff] }
  0x21   :  { %184 = vmatpush.msra.mxu1 %v53_v60  ;;  %223 = vmatpush.msra.mxu3 %v119_v62  ;;  %v68_v32 = vld [vmem:[%s990_s3 + $0x178] sm:$0xff]  ;;  %v134_v34 = vld [vmem:[%s990_s3 + $0x388] sm:$0xff]  ;;  %v875_v39 = vld [vmem:[%s991_s1 + $0x10] sm:$0xff] }
  0x22   :  { %204 = vmatpush.msra.mxu2 %v85_v61  ;;  %229 = vmatpush.msrb.mxu0 %v52_v63  ;;  %v100_v33 = vld [vmem:[%s990_s3 + $0x278] sm:$0xff]  ;;  %v34_v35 = vld [vmem:[%s990_s3 + $0x68] sm:$0xff]  ;;  %v17_v49 = vld [vmem:[%s991_s1] sm:$0xff] }
  0x23   :  { %249 = vmatpush.msrb.mxu1 %v84_v0  ;;  %224 = vmatpush.msra.mxu3 %v117_v2  ;;  %v66_v36 = vld [vmem:[%s990_s3 + $0x168] sm:$0xff]  ;;  %v132_v38 = vld [vmem:[%s990_s3 + $0x378] sm:$0xff] }
  0x24   :  { %269 = vmatpush.msrb.mxu2 %v116_v1  ;;  %230 = vmatpush.msrb.mxu0 %v50_v3  ;;  %v98_v37 = vld [vmem:[%s990_s3 + $0x268] sm:$0xff]  ;;  %v32_v40 = vld [vmem:[%s990_s3 + $0x58] sm:$0xff]  ;;  %v309_v3 = vld [vmem:[%s992_s2] sm:$0xff] }
  0x25   :  { %250 = vmatpush.msrb.mxu1 %v82_v4  ;;  %289 = vmatpush.msrb.mxu3 %v148_v6  ;;  %v64_v41 = vld [vmem:[%s990_s3 + $0x158] sm:$0xff]  ;;  %v130_v43 = vld [vmem:[%s990_s3 + $0x368] sm:$0xff]  ;;  %v311_v6 = vld [vmem:[%s993_s0] sm:$0x3] }
  0x26   :  { %270 = vmatpush.msrb.mxu2 %v114_v5  ;;  %231 = vmatpush.msrb.mxu0 %v48_v7  ;;  %v96_v42 = vld [vmem:[%s990_s3 + $0x258] sm:$0xff]  ;;  %v30_v44 = vld [vmem:[%s990_s3 + $0x48] sm:$0xff] }
  0x27   :  { %251 = vmatpush.msrb.mxu1 %v80_v8  ;;  %290 = vmatpush.msrb.mxu3 %v146_v10  ;;  %v20_v45 = vld [vmem:[%s991_s1 + $0x18] sm:$0xff]  ;;  %v62_v46 = vld [vmem:[%s990_s3 + $0x148] sm:$0xff] }
  0x28   :  { %271 = vmatpush.msrb.mxu2 %v112_v9  ;;  %232 = vmatpush.msrb.mxu0 %v46_v11  ;;  %v94_v47 = vld [vmem:[%s990_s3 + $0x248] sm:$0xff]  ;;  %v128_v48 = vld [vmem:[%s990_s3 + $0x358] sm:$0xff] }
  0x29   :  { %252 = vmatpush.msrb.mxu1 %v78_v12  ;;  %291 = vmatpush.msrb.mxu3 %v144_v14  ;;  %v18_v50 = vld [vmem:[%s991_s1 + $0x8] sm:$0xff]  ;;  %v28_v51 = vld [vmem:[%s990_s3 + $0x38] sm:$0xff] }
  0x2a   :  { %272 = vmatpush.msrb.mxu2 %v110_v13  ;;  %233 = vmatpush.msrb.mxu0 %v44_v15  ;;  %v60_v52 = vld [vmem:[%s990_s3 + $0x138] sm:$0xff]  ;;  %v126_v54 = vld [vmem:[%s990_s3 + $0x348] sm:$0xff] }
  0x2b   :  { %253 = vmatpush.msrb.mxu1 %v76_v16  ;;  %292 = vmatpush.msrb.mxu3 %v142_v18  ;;  %v92_v53 = vld [vmem:[%s990_s3 + $0x238] sm:$0xff]  ;;  %v26_v55 = vld [vmem:[%s990_s3 + $0x28] sm:$0xff] }
  0x2c   :  { %273 = vmatpush.msrb.mxu2 %v108_v17  ;;  %234 = vmatpush.msrb.mxu0 %v42_v19  ;;  %v58_v56 = vld [vmem:[%s990_s3 + $0x128] sm:$0xff]  ;;  %v124_v58 = vld [vmem:[%s990_s3 + $0x338] sm:$0xff] }
  0x2d   :  { %254 = vmatpush.msrb.mxu1 %v74_v20  ;;  %293 = vmatpush.msrb.mxu3 %v140_v22  ;;  %v90_v57 = vld [vmem:[%s990_s3 + $0x228] sm:$0xff]  ;;  %v24_v59 = vld [vmem:[%s990_s3 + $0x18] sm:$0xff] }
  0x2e   :  { %274 = vmatpush.msrb.mxu2 %v106_v21  ;;  %235 = vmatpush.msrb.mxu0 %v40_v23  ;;  %v56_v60 = vld [vmem:[%s990_s3 + $0x118] sm:$0xff]  ;;  %v122_v62 = vld [vmem:[%s990_s3 + $0x328] sm:$0xff] }
  0x2f   :  { %255 = vmatpush.msrb.mxu1 %v72_v24  ;;  %294 = vmatpush.msrb.mxu3 %v138_v26  ;;  %v88_v61 = vld [vmem:[%s990_s3 + $0x218] sm:$0xff]  ;;  %v22_v63 = vld [vmem:[%s990_s3 + $0x8] sm:$0xff] }
  0x30   :  { %275 = vmatpush.msrb.mxu2 %v104_v25  ;;  %236 = vmatpush.msrb.mxu0 %v38_v27  ;;  %v54_v0 = vld [vmem:[%s990_s3 + $0x108] sm:$0xff]  ;;  %v120_v2 = vld [vmem:[%s990_s3 + $0x318] sm:$0xff] }
  0x31   :  { %256 = vmatpush.msrb.mxu1 %v70_v28  ;;  %295 = vmatpush.msrb.mxu3 %v136_v30  ;;  %v86_v1 = vld [vmem:[%s990_s3 + $0x208] sm:$0xff] }
  0x32   :  { %276 = vmatpush.msrb.mxu2 %v102_v29  ;;  %237 = vmatpush.msrb.mxu0 %v36_v31  ;;  %v118_v4 = vld [vmem:[%s990_s3 + $0x308] sm:$0xff] }
  0x33   :  { %257 = vmatpush.msrb.mxu1 %v68_v32  ;;  %296 = vmatpush.msrb.mxu3 %v134_v34  ;;  %v310_v5 = vld [vmem:[%s992_s2 + $0x8] sm:$0xff] }
  0x34   :  { %277 = vmatpush.msrb.mxu2 %v100_v33  ;;  %238 = vmatpush.msrb.mxu0 %v34_v35 }
  0x35   :  { %258 = vmatpush.msrb.mxu1 %v66_v36  ;;  %297 = vmatpush.msrb.mxu3 %v132_v38 }
  0x36   :  { %278 = vmatpush.msrb.mxu2 %v98_v37  ;;  %239 = vmatpush.msrb.mxu0 %v32_v40 }
  0x37   :  { %205 = vmatmul.f32.vlgmr.msra.gmra.mxu2 %v875_v39  ;;  %259 = vmatpush.msrb.mxu1 %v64_v41 }
  0x38   :  { %279 = vmatpush.msrb.mxu2 %v96_v42  ;;  %298 = vmatpush.msrb.mxu3 %v130_v43 }
  0x39   :  { %240 = vmatpush.msrb.mxu0 %v30_v44  ;;  %225 = vmatmul.f32.vlgmr.msra.gmra.mxu3 %v20_v45 }
  0x3a   :  { %260 = vmatpush.msrb.mxu1 %v62_v46  ;;  %280 = vmatpush.msrb.mxu2 %v94_v47 }
  0x3b   :  { %299 = vmatpush.msrb.mxu3 %v128_v48  ;;  %165 = vmatmul.f32.vlgmr.msra.gmra.mxu0 %v17_v49 }
  0x3c   :  { %185 = vmatmul.f32.vlgmr.msra.gmra.mxu1 %v18_v50  ;;  %241 = vmatpush.msrb.mxu0 %v28_v51 }
  0x3d   :  { %261 = vmatpush.msrb.mxu1 %v60_v52  ;;  %281 = vmatpush.msrb.mxu2 %v92_v53 }
  0x3e   :  { %300 = vmatpush.msrb.mxu3 %v126_v54  ;;  %242 = vmatpush.msrb.mxu0 %v26_v55 }
  0x3f   :  { %262 = vmatpush.msrb.mxu1 %v58_v56  ;;  %282 = vmatpush.msrb.mxu2 %v90_v57 }
  0x40   :  { %301 = vmatpush.msrb.mxu3 %v124_v58  ;;  %243 = vmatpush.msrb.mxu0 %v24_v59 }
  0x41   :  { %263 = vmatpush.msrb.mxu1 %v56_v60  ;;  %283 = vmatpush.msrb.mxu2 %v88_v61 }
  0x42   :  { %302 = vmatpush.msrb.mxu3 %v122_v62  ;;  %244 = vmatpush.msrb.mxu0 %v22_v63 }
  0x43   :  { %264 = vmatpush.msrb.mxu1 %v54_v0  ;;  %284 = vmatpush.msrb.mxu2 %v86_v1 }
  0x44   :  { %303 = vmatpush.msrb.mxu3 %v120_v2  ;;  %245 = vmatmul.f32.vlgmr.msrb.gmra.mxu0 %v17_v49 }
  0x45   :  { %265 = vmatmul.f32.vlgmr.msrb.gmra.mxu1 %v18_v50  ;;  %285 = vmatmul.f32.vlgmr.msrb.gmra.mxu2 %v875_v39 }
  0x46   :  { %331 = vmatpush.msra.mxu0 %v309_v3  ;;  %304 = vmatpush.msrb.mxu3 %v118_v4 }
  0x47   :  { %351 = vmatpush.msra.mxu1 %v310_v5  ;;  %305 = vmatmul.f32.vlgmr.msrb.gmra.mxu3 %v20_v45 }
  0x48   :  { %380 = vmatpush.msra.mxu2 %v309_v3  ;;  %400 = vmatpush.msra.mxu3 %v310_v5 }
  0x49   :  { %427 = vmatpush.msrb.mxu0 %v309_v3  ;;  %447 = vmatpush.msrb.mxu1 %v310_v5 }
  0x4a   :  { %474 = vmatpush.msrb.mxu2 %v309_v3  ;;  %494 = vmatpush.msrb.mxu3 %v310_v5 }
  0x4c   :  { %530 = vmatmul.msk.f32.vlgmr.msra.gmra.mxu0 %vm312_vm0, %v311_v6 }
  0x4d   :  { %531 = vmatmul.msk.f32.vlgmr.msra.gmra.mxu1 %vm312_vm0, %v311_v6 }
  0xb8   :  { %v166_v7 = vpop.f32.mrf.mxu0 }
  0xb9   :  { %v186_v8 = vpop.f32.mrf.mxu1 }
  0xba   :  { %v187_v9 = vadd.f32 %v186_v8, %v166_v7  ;;  %v206_v10 = vpop.f32.mrf.mxu2 }
  0xbc   :  { %v207_v12 = vadd.f32 %v206_v10, %v187_v9  ;;  %v226_v13 = vpop.f32.mrf.mxu3 }
  0xbe   :  { %v227_v14 = vadd.f32 %v226_v13, %v207_v12 }
  0xc0   :  { %v358_v18 = vrot.slane %v227_v14, 2  ;;  %v405_v21 = vrot.slane %v227_v14, 4  ;;  %v452_v41 = vrot.slane %v227_v14, 6 }
  0xc1   :  { %v246_v11 = vpop.f32.mrf.mxu0 }
  0xc2   :  { %v266_v28 = vpop.f32.mrf.mxu1 }
  0xc3   :  { %v267_v29 = vadd.f32 %v266_v28, %v246_v11 }
  0xc8   :  { %v286_v17 = vpop.f32.mrf.mxu2 }
  0xc9   :  { %v333_v15 = vpop.f32.mrf.mxu0  ;;  %v287_v31 = vadd.f32 %v286_v17, %v267_v29 }
  0xca   :  { %v334_v16 = vadd.f32 %v333_v15, %v227_v14  ;;  %v306_v30 = vpop.f32.mrf.mxu3  ;;  %v353_v32 = vpop.f32.mrf.mxu1 }
  0xcb   :  { %v307_v33 = vadd.f32 %v306_v30, %v287_v31 }
  0xcc   :  { %532 = vmatmul.msk.f32.vlgmr.msra.gmra.mxu2 %vm312_vm0, %v334_v16  ;;  %533 = vmatmul.msk.f32.vlgmr.msra.gmra.mxu3 %vm312_vm0, %v334_v16 }
  0xcd   :  { %v359_v35 = vrot.slane %v307_v33, 2  ;;  %v406_v37 = vrot.slane %v307_v33, 4  ;;  %v453_v42 = vrot.slane %v307_v33, 6  ;;  %v354_v46 = vadd.f32 %v353_v32, %v307_v33 }
 0x14f   :  { %v382_v19 = vpop.f32.mrf.mxu2  ;;  %v402_v34 = vpop.f32.mrf.mxu3 }
 0x150   :  { %v383_v20 = vadd.f32 %v382_v19, %v358_v18  ;;  %v403_v38 = vadd.f32 %v402_v34, %v359_v35 }
 0x152   :  { %534 = vmatmul.msk.f32.vlgmr.msrb.gmra.mxu0 %vm312_vm0, %v383_v20  ;;  %535 = vmatmul.msk.f32.vlgmr.msrb.gmra.mxu1 %vm312_vm0, %v383_v20  ;;  %v500_v22 = vrot.slane %v383_v20, 6  ;;  %v501_v40 = vrot.slane %v403_v38, 6 }
 0x154   :  { %v516_v26 = vsel %vm515_vm1, %v334_v16, %v500_v22  ;;  %v517_v49 = vsel %vm515_vm1, %v354_v46, %v501_v40 }
 0x1cf   :  { %v429_v23 = vpop.f32.mrf.mxu0  ;;  %v449_v36 = vpop.f32.mrf.mxu1 }
 0x1d0   :  { %v430_v24 = vadd.f32 %v429_v23, %v405_v21  ;;  %v450_v39 = vadd.f32 %v449_v36, %v406_v37 }
 0x1d2   :  { %v505_v25 = vrot.slane %v430_v24, 4  ;;  %536 = vmatmul.msk.f32.vlgmr.msrb.gmra.mxu2 %vm312_vm0, %v430_v24  ;;  %537 = vmatmul.msk.f32.vlgmr.msrb.gmra.mxu3 %vm312_vm0, %v430_v24  ;;  %v506_v43 = vrot.slane %v450_v39, 4 }
 0x1d4   :  { %v519_v27 = vsel %vm518_vm2, %v516_v26, %v505_v25  ;;  %v520_v52 = vsel %vm518_vm2, %v517_v49, %v506_v43 }
 0x255   :  { %v476_v44 = vpop.f32.mrf.mxu2  ;;  %v496_v45 = vpop.f32.mrf.mxu3 }
 0x256   :  { %v477_v47 = vadd.f32 %v476_v44, %v452_v41  ;;  %v497_v48 = vadd.f32 %v496_v45, %v453_v42 }
 0x258   :  { %v511_v50 = vrot.slane %v477_v47, 2  ;;  %v512_v51 = vrot.slane %v497_v48, 2 }
 0x25a   :  { %v522_v53 = vsel %vm521_vm3, %v519_v27, %v511_v50  ;;  %v523_v54 = vsel %vm521_vm3, %v520_v52, %v512_v51 }
 0x25b   :  { %524 = vst [vmem:[%s994_s4] sm:$0xff] %v522_v53 }
 0x25c   :  { %525 = vst [vmem:[%s994_s4 + $0x8] sm:$0xff] %v523_v54 }

</bundles_post_ra>
